<compile_context>
chip_gen: v7x
topology: tpu7x:2x2x1
jax: 0.10.0
libtpu: 0.0.40
codegen_flags: <defaults>
</compile_context>

<pallas_src>
import functools

import jax
import jax.numpy as jnp
from jax import lax
from jax.experimental import pallas as pl
from jax.experimental.pallas import tpu as pltpu

LANES = 128
MAX_TILE_ROWS = 4096   # (4096, 128) f32 tile = 2 MiB per input per buffer
ACC_ROWS = 256         # fixed VMEM accumulator height (128 KiB per accumulator)


def _round_up(v, m):
    return ((v + m - 1) // m) * m


def _iou_partials_kernel(x_ref, t_ref, out_int_ref, out_tot_ref,
                         acc_int_ref, acc_tot_ref, *,
                         rows, tile_rows, acc_rows, steps_per_core, mask_needed):
    c = pl.program_id(0)   # core-split index ("parallel")
    i = pl.program_id(1)   # streaming step within this core ("arbitrary")

    # Zero this core's vector accumulators at the start of its stream.
    @pl.when(i == 0)
    def _():
        acc_int_ref[...] = jnp.zeros_like(acc_int_ref)
        acc_tot_ref[...] = jnp.zeros_like(acc_tot_ref)

    # First global row covered by this tile (unclamped; may exceed `rows` for
    # ragged / duplicated tiles, which are then fully masked below).
    tile_row0 = (c * steps_per_core + i) * tile_rows

    # Chunked streaming accumulation: pure VPU/EUP work per step, no per-step
    # cross-lane reduce, and accumulator size independent of the tile size.
    for c0 in range(0, tile_rows, acc_rows):
        csz = min(acc_rows, tile_rows - c0)
        x = x_ref[pl.ds(c0, csz), :].astype(jnp.float32)
        t = t_ref[pl.ds(c0, csz), :].astype(jnp.float32)
        # sigmoid(x) == 0.5 * tanh(x / 2) + 0.5  -> single EUP push per vreg.
        s = 0.5 * jnp.tanh(0.5 * x) + 0.5
        p_int = s * t
        p_tot = s + t
        if mask_needed:
            # Mask rows past the end of the real data (ragged last block and
            # any duplicated block created by the 2-core split).
            row_idx = lax.broadcasted_iota(jnp.int32, (csz, LANES), 0)
            limit = rows - tile_row0 - c0
            valid = row_idx < limit
            p_int = jnp.where(valid, p_int, 0.0)
            p_tot = jnp.where(valid, p_tot, 0.0)
        acc_int_ref[pl.ds(0, csz), :] += p_int
        acc_tot_ref[pl.ds(0, csz), :] += p_tot

    # One sublane (XLU) reduction per core at the very end; outputs stay
    # lane-dense (1, 128). Final lane reduce + scalar IoU math happen in JAX.
    @pl.when(i == pl.num_programs(1) - 1)
    def _():
        out_int_ref[...] = jnp.sum(acc_int_ref[...], axis=0, keepdims=True)
        out_tot_ref[...] = jnp.sum(acc_tot_ref[...], axis=0, keepdims=True)


def iou_loss(inputs, targets, smooth=1.0):
    """Pallas TPU implementation of IoULoss.forward (returns a scalar f32)."""
    n = inputs.size
    assert targets.size == n, "inputs and targets must have the same number of elements"

    # Free reshapes; inputs/targets stay in their native dtypes (no extra HBM pass).
    x = jnp.reshape(inputs, (-1,))
    t = jnp.reshape(targets, (-1,))

    n_main = (n // LANES) * LANES
    n_tail = n - n_main

    # Sub-128-element ragged tail: tiny plain-JAX reduction.
    if n_tail:
        xt = x[n_main:].astype(jnp.float32)
        tt = t[n_main:].astype(jnp.float32)
        st = jax.nn.sigmoid(xt)
        tail_int = jnp.sum(st * tt)
        tail_tot = jnp.sum(st + tt)
    else:
        tail_int = jnp.float32(0.0)
        tail_tot = jnp.float32(0.0)

    if n_main:
        rows = n_main // LANES
        if n_tail:
            # TODO(synk): this prefix slice copies the aligned part; only hit
            # when numel is not a multiple of 128 (rare for segmentation shapes).
            x_main, t_main = x[:n_main], t[:n_main]
        else:
            x_main, t_main = x, t          # reshape of contiguous data: free
        x2d = x_main.reshape(rows, LANES)
        t2d = t_main.reshape(rows, LANES)

        if rows <= MAX_TILE_ROWS:
            # Whole problem fits one tile: single core, exact full-extent block.
            ncores, steps_per_core, tile_rows = 1, 1, rows
            acc_rows = rows
            mask_needed = False
        else:
            # Shard the streaming reduction over 2 TensorCores (v7x); on 1-TC
            # chips this just runs as a sequential loop over the same blocks.
            ncores = 2
            rows_per_core = pl.cdiv(rows, ncores)
            steps_per_core = pl.cdiv(rows_per_core, MAX_TILE_ROWS)
            tile_rows = _round_up(pl.cdiv(rows_per_core, steps_per_core), 32)
            acc_rows = ACC_ROWS
            mask_needed = (ncores * steps_per_core * tile_rows != rows)

        num_tiles = pl.cdiv(rows, tile_rows)
        last_tile = num_tiles - 1

        def tile_map(c, i):
            # Clamp so the DMA never targets a fully out-of-range block; any
            # duplicated block is zeroed by the in-kernel mask.
            return (jnp.minimum(c * steps_per_core + i, last_tile), 0)

        kernel = functools.partial(
            _iou_partials_kernel,
            rows=rows, tile_rows=tile_rows, acc_rows=acc_rows,
            steps_per_core=steps_per_core, mask_needed=mask_needed)

        part_int, part_tot = pl.pallas_call(
            kernel,
            out_shape=(jax.ShapeDtypeStruct((ncores, LANES), jnp.float32),
                       jax.ShapeDtypeStruct((ncores, LANES), jnp.float32)),
            grid_spec=pltpu.PrefetchScalarGridSpec(
                num_scalar_prefetch=0,
                grid=(ncores, steps_per_core),
                in_specs=[
                    pl.BlockSpec((tile_rows, LANES), tile_map),
                    pl.BlockSpec((tile_rows, LANES), tile_map),
                ],
                out_specs=[
                    pl.BlockSpec((1, LANES), lambda c, i: (c, 0)),
                    pl.BlockSpec((1, LANES), lambda c, i: (c, 0)),
                ],
                scratch_shapes=[
                    pltpu.VMEM((acc_rows, LANES), jnp.float32),  # intersection
                    pltpu.VMEM((acc_rows, LANES), jnp.float32),  # total
                ],
            ),
            compiler_params=pltpu.CompilerParams(
                dimension_semantics=("parallel", "arbitrary"),
                vmem_limit_bytes=32 * 1024 * 1024,
            ),
        )(x2d, t2d)

        intersection = jnp.sum(part_int) + tail_int
        total = jnp.sum(part_tot) + tail_tot
    else:
        intersection = tail_int
        total = tail_tot

    smooth = jnp.float32(smooth)
    union = total - intersection
    iou = (intersection + smooth) / (union + smooth)
    return jnp.float32(1.0) - iou


def _iou_loss_ref(inputs, targets, smooth=1.0):
    s = jax.nn.sigmoid(inputs.astype(jnp.float32)).reshape(-1)
    t = targets.astype(jnp.float32).reshape(-1)
    intersection = jnp.sum(s * t)
    total = jnp.sum(s + t)
    union = total - intersection
    return 1.0 - (intersection + smooth) / (union + smooth)


if __name__ == "__main__":
    key = jax.random.PRNGKey(0)
    k1, k2 = jax.random.split(key)

    # Small shapes consistent with a segmentation loss: (B, C, H, W) = (2, 4, 16, 16)
    inputs = jax.random.normal(k1, (2, 4, 16, 16), dtype=jnp.float32)
    targets = (jax.random.uniform(k2, (2, 4, 16, 16)) > 0.5).astype(jnp.float32)

    loss = jax.block_until_ready(iou_loss(inputs, targets, smooth=1.0))
    ref = _iou_loss_ref(inputs, targets, smooth=1.0)
    assert jnp.allclose(loss, ref, atol=1e-4, rtol=1e-4), (loss, ref)

    print("KERNEL_OK")
</pallas_src>

<mosaic_0001>
module attributes {stable_mosaic.version = 11 : i64} {
  func.func @_iou_partials_kernel(%arg0: i32, %arg1: i32, %arg2: memref<16x128xf32, #tpu.memory_space<vmem>>, %arg3: memref<16x128xf32, #tpu.memory_space<vmem>>, %arg4: memref<1x128xf32, #tpu.memory_space<vmem>>, %arg5: memref<1x128xf32, #tpu.memory_space<vmem>>, %arg6: memref<16x128xf32, #tpu.memory_space<vmem>>, %arg7: memref<16x128xf32, #tpu.memory_space<vmem>>) attributes {dimension_semantics = [#tpu.dimension_semantics<parallel>, #tpu.dimension_semantics<arbitrary>], iteration_bounds = array<i64: 1, 1>, scalar_prefetch = 0 : i64, scratch_operands = 2 : i64, tpu.core_type = #tpu.core_type<tc>, window_params = [{transform_indices = @transform_0, window_bounds = array<i64: 16, 128>}, {transform_indices = @transform_1, window_bounds = array<i64: 16, 128>}, {transform_indices = @transform_2, window_bounds = array<i64: 1, 128>}, {transform_indices = @transform_3, window_bounds = array<i64: 1, 128>}]} {
    %c0_i32 = arith.constant 0 : i32
    %0 = arith.cmpi eq, %arg1, %c0_i32 : i32
    %1 = arith.extui %0 : i1 to i32
    %c0_i32_0 = arith.constant 0 : i32
    %2 = arith.cmpi ne, %1, %c0_i32_0 : i32
    scf.if %2 {
      %cst_16 = arith.constant 0.000000e+00 : f32
      %23 = vector.broadcast %cst_16 : f32 to vector<16x128xf32>
      %c0_17 = arith.constant 0 : index
      %c0_18 = arith.constant 0 : index
      %24 = vector.load %arg6[%c0_17, %c0_18] : memref<16x128xf32, #tpu.memory_space<vmem>>, vector<16x128xf32>
      tpu.vector_store %arg6[%c0_17, %c0_18], %23 {strides = array<i32>} : memref<16x128xf32, #tpu.memory_space<vmem>>, vector<16x128xf32>,
      %cst_19 = arith.constant 0.000000e+00 : f32
      %25 = vector.broadcast %cst_19 : f32 to vector<16x128xf32>
      %c0_20 = arith.constant 0 : index
      %c0_21 = arith.constant 0 : index
      %26 = vector.load %arg7[%c0_20, %c0_21] : memref<16x128xf32, #tpu.memory_space<vmem>>, vector<16x128xf32>
      tpu.vector_store %arg7[%c0_20, %c0_21], %25 {strides = array<i32>} : memref<16x128xf32, #tpu.memory_space<vmem>>, vector<16x128xf32>,
    } else {
    }
    %c0 = arith.constant 0 : index
    %c0_1 = arith.constant 0 : index
    %3 = vector.load %arg2[%c0, %c0_1] : memref<16x128xf32, #tpu.memory_space<vmem>>, vector<16x128xf32>
    %c0_2 = arith.constant 0 : index
    %c0_3 = arith.constant 0 : index
    %4 = vector.load %arg3[%c0_2, %c0_3] : memref<16x128xf32, #tpu.memory_space<vmem>>, vector<16x128xf32>
    %cst = arith.constant 5.000000e-01 : f32
    %5 = vector.broadcast %cst : f32 to vector<16x128xf32>
    %6 = arith.mulf %5, %3 : vector<16x128xf32>
    %7 = math.tanh %6 : vector<16x128xf32>
    %cst_4 = arith.constant 5.000000e-01 : f32
    %8 = vector.broadcast %cst_4 : f32 to vector<16x128xf32>
    %9 = arith.mulf %8, %7 : vector<16x128xf32>
    %cst_5 = arith.constant 5.000000e-01 : f32
    %10 = vector.broadcast %cst_5 : f32 to vector<16x128xf32>
    %11 = arith.addf %9, %10 : vector<16x128xf32>
    %12 = arith.mulf %11, %4 : vector<16x128xf32>
    %13 = arith.addf %11, %4 : vector<16x128xf32>
    %c0_6 = arith.constant 0 : index
    %c0_7 = arith.constant 0 : index
    %14 = vector.load %arg6[%c0_6, %c0_7] : memref<16x128xf32, #tpu.memory_space<vmem>>, vector<16x128xf32>
    %15 = arith.addf %14, %12 : vector<16x128xf32>
    %c0_8 = arith.constant 0 : index
    %c0_9 = arith.constant 0 : index
    %16 = vector.load %arg6[%c0_8, %c0_9] : memref<16x128xf32, #tpu.memory_space<vmem>>, vector<16x128xf32>
    tpu.vector_store %arg6[%c0_8, %c0_9], %15 {strides = array<i32>} : memref<16x128xf32, #tpu.memory_space<vmem>>, vector<16x128xf32>,
    %c0_10 = arith.constant 0 : index
    %c0_11 = arith.constant 0 : index
    %17 = vector.load %arg7[%c0_10, %c0_11] : memref<16x128xf32, #tpu.memory_space<vmem>>, vector<16x128xf32>
    %18 = arith.addf %17, %13 : vector<16x128xf32>
    %c0_12 = arith.constant 0 : index
    %c0_13 = arith.constant 0 : index
    %19 = vector.load %arg7[%c0_12, %c0_13] : memref<16x128xf32, #tpu.memory_space<vmem>>, vector<16x128xf32>
    tpu.vector_store %arg7[%c0_12, %c0_13], %18 {strides = array<i32>} : memref<16x128xf32, #tpu.memory_space<vmem>>, vector<16x128xf32>,
    %c0_i32_14 = arith.constant 0 : i32
    %20 = arith.cmpi eq, %arg1, %c0_i32_14 : i32
    %21 = arith.extui %20 : i1 to i32
    %c0_i32_15 = arith.constant 0 : i32
    %22 = arith.cmpi ne, %21, %c0_i32_15 : i32
    scf.if %22 {
      %c0_16 = arith.constant 0 : index
      %c0_17 = arith.constant 0 : index
      %23 = vector.load %arg6[%c0_16, %c0_17] : memref<16x128xf32, #tpu.memory_space<vmem>>, vector<16x128xf32>
      %cst_18 = arith.constant dense<0.000000e+00> : vector<128xf32>
      %24 = vector.multi_reduction <add>, %23, %cst_18 [0] : vector<16x128xf32> to vector<128xf32>
      %25 = vector.shape_cast %24 : vector<128xf32> to vector<1x128xf32>
      %c0_19 = arith.constant 0 : index
      %c0_20 = arith.constant 0 : index
      %26 = vector.load %arg4[%c0_19, %c0_20] : memref<1x128xf32, #tpu.memory_space<vmem>>, vector<1x128xf32>
      tpu.vector_store %arg4[%c0_19, %c0_20], %25 {strides = array<i32>} : memref<1x128xf32, #tpu.memory_space<vmem>>, vector<1x128xf32>,
      %c0_21 = arith.constant 0 : index
      %c0_22 = arith.constant 0 : index
      %27 = vector.load %arg7[%c0_21, %c0_22] : memref<16x128xf32, #tpu.memory_space<vmem>>, vector<16x128xf32>
      %cst_23 = arith.constant dense<0.000000e+00> : vector<128xf32>
      %28 = vector.multi_reduction <add>, %27, %cst_23 [0] : vector<16x128xf32> to vector<128xf32>
      %29 = vector.shape_cast %28 : vector<128xf32> to vector<1x128xf32>
      %c0_24 = arith.constant 0 : index
      %c0_25 = arith.constant 0 : index
      %30 = vector.load %arg5[%c0_24, %c0_25] : memref<1x128xf32, #tpu.memory_space<vmem>>, vector<1x128xf32>
      tpu.vector_store %arg5[%c0_24, %c0_25], %29 {strides = array<i32>} : memref<1x128xf32, #tpu.memory_space<vmem>>, vector<1x128xf32>,
    } else {
    }
    return
  }
  func.func @transform_0(%arg0: i32, %arg1: i32) -> (i32, i32) {
    %c1_i32 = arith.constant 1 : i32
    %0 = arith.muli %arg0, %c1_i32 : i32
    %1 = arith.addi %0, %arg1 : i32
    %c0_i32 = arith.constant 0 : i32
    %2 = arith.minsi %1, %c0_i32 : i32
    %c0_i32_0 = arith.constant 0 : i32
    %c0_i32_1 = arith.constant 0 : i32
    return %2, %c0_i32_0 : i32, i32
  }
  func.func @transform_1(%arg0: i32, %arg1: i32) -> (i32, i32) {
    %c1_i32 = arith.constant 1 : i32
    %0 = arith.muli %arg0, %c1_i32 : i32
    %1 = arith.addi %0, %arg1 : i32
    %c0_i32 = arith.constant 0 : i32
    %2 = arith.minsi %1, %c0_i32 : i32
    %c0_i32_0 = arith.constant 0 : i32
    %c0_i32_1 = arith.constant 0 : i32
    return %2, %c0_i32_0 : i32, i32
  }
  func.func @transform_2(%arg0: i32, %arg1: i32) -> (i32, i32) {
    %c0_i32 = arith.constant 0 : i32
    %c0_i32_0 = arith.constant 0 : i32
    return %arg0, %c0_i32 : i32, i32
  }
  func.func @transform_3(%arg0: i32, %arg1: i32) -> (i32, i32) {
    %c0_i32 = arith.constant 0 : i32
    %c0_i32_0 = arith.constant 0 : i32
    return %arg0, %c0_i32 : i32, i32
  }
}

</mosaic_0001>

<bundles_post_ra>
// kernel: tpu_custom_call.1
= control target key start
LH: loop header
LB: loop body
LE: loop exit
PB: predicated region body
PF: predicated region fallthrough
CT: control target
= control target key end

     0   :  { %9 = vsyncpa [#allocation5], 0  ;;  %s344_s0 = inlined_call_operand.hbm [shape: f32[16,128], index: 0, kind: input, shape index: {}]   ;;  %s345_s1 = inlined_call_operand.hbm [shape: f32[16,128], index: 1, kind: input, shape index: {}]   ;;  %s346_s2 = inlined_call_operand.hbm [shape: f32[1,128], index: 2, kind: output, shape index: {0}]   ;;  %s347_s3 = inlined_call_operand.hbm [shape: f32[1,128], index: 3, kind: output, shape index: {1}]  }
   0x1   :  { %10 = vsyncpa [#allocation8], 0 }
   0x2   :  { %11 = vsyncpa [#allocation6], 0 }
   0x3   :  { %12 = vsyncpa [#allocation11], 0  ;;  %s262_s12 = smov [#allocation4]   ;;  %s166_s16 = scalar_lea.hbm %s344_s0, 256 }
   0x4   :  { %s24_s13 = sshll.u32 %s262_s12, 4  ;;  %p167_p0 = scmp.ne.s32.totalorder %s344_s0, %s166_s16  ;;  %s25_s13 = int_to_ptr.vmem [resolvable:$true] %s24_s13 }
   0x5   :  { %p170_p1 = scmp.lt.u32.totalorder %s166_s16, %s344_s0 }
   0x7   :  { %p172_p2 = pnand %p170_p1, %p167_p0 }
   0x9   :  { %175 = shalt.err (!%p172_p2)
}
   0xa   :  { %s176_s21 = scalar_lea.vmem %s25_s13, 256  ;;  %p181_p4 = scmp.lt.s32.totalorder %s25_s13, %s25_s13 }
   0xb   :  { %p177_p3 = scmp.ne.s32.totalorder %s25_s13, %s176_s21  ;;  %p182_p5 = scmp.lt.s32.totalorder %s176_s21, %s176_s21 }
   0xd   :  { %p183_p6 = por %p182_p5, %p181_p4 }
   0xf   :  { %p184_p7 = pnand %p183_p6, %p177_p3 }
  0x11   :  { %187 = shalt.err (!%p184_p7)
}
  0x12   :  { %s263_s22 = smov 128   ;;  %s264_s23 = smov 8  }
  0x13   :  { %30 = dma.hbm_to_vmem [thread:$0]  %s344_s0, 256, %s25_s13, [#allocation5], %s263_s22, %s263_s22, %s264_s23  }
  0x14   :  { %s265_s26 = smov [#allocation7]   ;;  %s188_s30 = scalar_lea.hbm %s345_s1, 256 }
  0x15   :  { %s42_s27 = sshll.u32 %s265_s26, 4  ;;  %p189_p8 = scmp.ne.s32.totalorder %s345_s1, %s188_s30  ;;  %s43_s27 = int_to_ptr.vmem [resolvable:$true] %s42_s27 }
  0x16   :  { %p192_p9 = scmp.lt.u32.totalorder %s188_s30, %s345_s1 }
  0x18   :  { %p194_p10 = pnand %p192_p9, %p189_p8 }
  0x1a   :  { %197 = shalt.err (!%p194_p10)
}
  0x1b   :  { %s198_s8 = scalar_lea.vmem %s43_s27, 256  ;;  %p203_p12 = scmp.lt.s32.totalorder %s43_s27, %s43_s27 }
  0x1c   :  { %p199_p11 = scmp.ne.s32.totalorder %s43_s27, %s198_s8  ;;  %p204_p13 = scmp.lt.s32.totalorder %s198_s8, %s198_s8 }
  0x1e   :  { %p205_p0 = por %p204_p13, %p203_p12 }
  0x20   :  { %p206_p1 = pnand %p205_p0, %p199_p11 }
  0x22   :  { %209 = shalt.err (!%p206_p1)
}
  0x23   :  { %48 = dma.hbm_to_vmem [thread:$0]  %s345_s1, 256, %s43_s27, [#allocation8], %s263_s22, %s263_s22, %s264_s23  }
  0x24   :  { %254 = dma.done.wait [#allocation5], 256  }
  0x25   :  { %255 = vsyncadd [#allocation5], 4294967040 }
  0x26   :  { %256 = dma.done.wait [#allocation8], 256  }
  0x27   :  { %257 = vsyncadd [#allocation8], 4294967040  ;;  %v71_v0 = vld [vmem:[#allocation4] sm:$0xff]  ;;  %v72_v1 = vld [vmem:[#allocation4 + $0x8] sm:$0xff]  ;;  %s266_s1 = smov [#allocation9]   ;;  %s267_s11 = smov [#allocation10]  }
  0x28   :  { %v75_v2 = vmul.f32 0.5, %v71_v0  ;;  %v76_v3 = vmul.f32 0.5, %v72_v1  ;;  %v73_v7 = vld [vmem:[#allocation7] sm:$0xff]  ;;  %v74_v9 = vld [vmem:[#allocation7 + $0x8] sm:$0xff]  ;;  %s128_s10 = sshll.u32 %s266_s1, 4  ;;  %s138_s12 = sshll.u32 %s267_s11, 4  ;;  %s129_s10 = int_to_ptr.vmem [resolvable:$true] %s128_s10  ;;  %s312_s12 = int_to_ptr.vmem [resolvable:$true] %s138_s12 }
  0x29   :  { %s210_s13 = scalar_lea.vmem %s129_s10, 16  ;;  %s214_s14 = scalar_lea.vmem %s129_s10, 32 }
  0x2a   :  { %162 = vtanh.f32 %v75_v2  ;;  %p211_p2 = scmp.ne.s32.totalorder %s129_s10, %s210_s13  ;;  %p215_p3 = scmp.lt.s32.totalorder %s129_s10, %s129_s10 }
  0x2b   :  { %164 = vtanh.f32 %v76_v3  ;;  %p216_p4 = scmp.lt.s32.totalorder %s214_s14, %s210_s13 }
  0x2d   :  { %p217_p5 = por %p216_p4, %p215_p3 }
  0x2f   :  { %p218_p6 = pnand %p217_p5, %p211_p2 }
  0x34   :  { %v163_v4 = vpop.eup %162 }
  0x35   :  { %v165_v5 = vpop.eup %164  ;;  %v79_v6 = vmul.f32 0.5, %v163_v4 }
  0x36   :  { %v80_v8 = vmul.f32 0.5, %v165_v5 }
  0x37   :  { %v81_v10 = vadd.f32 0.5, %v79_v6 }
  0x38   :  { %v82_v11 = vadd.f32 0.5, %v80_v8 }
  0x39   :  { %v83_v12 = vmul.f32 %v81_v10, %v73_v7  ;;  %v85_v13 = vadd.f32 %v81_v10, %v73_v7 }
  0x3a   :  { %v84_v14 = vmul.f32 %v82_v11, %v74_v9  ;;  %v86_v15 = vadd.f32 %v82_v11, %v74_v9 }
  0x3c   :  { %v104_v16 = vadd.f32 %v84_v14, %v83_v12  ;;  %v114_v17 = vadd.f32 %v86_v15, %v85_v13 }
  0x3e   :  { %v105_v18 = vrot.slane %v104_v16, 4  ;;  %v115_v19 = vrot.slane %v114_v17, 4 }
  0x40   :  { %v106_v20 = vadd.f32 %v105_v18, %v104_v16  ;;  %v116_v21 = vadd.f32 %v115_v19, %v114_v17 }
  0x42   :  { %v107_v22 = vrot.slane %v106_v20, 2  ;;  %v117_v23 = vrot.slane %v116_v21, 2 }
  0x44   :  { %v108_v24 = vadd.f32 %v107_v22, %v106_v20  ;;  %v118_v25 = vadd.f32 %v117_v23, %v116_v21 }
  0x46   :  { %v109_v26 = vrot.slane %v108_v24, 1  ;;  %v119_v27 = vrot.slane %v118_v25, 1 }
  0x48   :  { %v110_v28 = vadd.f32 %v109_v26, %v108_v24  ;;  %v120_v29 = vadd.f32 %v119_v27, %v118_v25 }
  0x4a   :  { %111 = vst [vmem:[#allocation9] sm:$0x1] %v110_v28  ;;  %121 = vst [vmem:[#allocation10] sm:$0x1] %v120_v29 }
  0x4b   :  { %221 = shalt.err (!%p218_p6)
}
  0x4c   :  { %s222_s17 = scalar_lea.hbm %s346_s2, 16 }
  0x4d   :  { %p223_p7 = scmp.ne.s32.totalorder %s346_s2, %s222_s17  ;;  %p226_p8 = scmp.lt.u32.totalorder %s222_s17, %s346_s2 }
  0x4f   :  { %p228_p9 = pnand %p226_p8, %p223_p7 }
  0x51   :  { %231 = shalt.err (!%p228_p9)
}
  0x52   :  { %131 = dma.vmem_to_hbm [thread:$0]  %s129_s10, 16, %s346_s2, [#allocation6]  }
  0x53   :  { %s232_s24 = scalar_lea.vmem %s312_s12, 16  ;;  %s236_s25 = scalar_lea.vmem %s312_s12, 32 }
  0x54   :  { %p233_p10 = scmp.ne.s32.totalorder %s312_s12, %s232_s24  ;;  %p237_p11 = scmp.lt.s32.totalorder %s312_s12, %s312_s12 }
  0x55   :  { %p238_p12 = scmp.lt.s32.totalorder %s236_s25, %s232_s24 }
  0x57   :  { %p239_p13 = por %p238_p12, %p237_p11 }
  0x59   :  { %p240_p0 = pnand %p239_p13, %p233_p10 }
  0x5b   :  { %243 = shalt.err (!%p240_p0)
}
  0x5c   :  { %s244_s28 = scalar_lea.hbm %s347_s3, 16 }
  0x5d   :  { %p245_p1 = scmp.ne.s32.totalorder %s347_s3, %s244_s28  ;;  %p248_p2 = scmp.lt.u32.totalorder %s244_s28, %s347_s3 }
  0x5f   :  { %p250_p3 = pnand %p248_p2, %p245_p1 }
  0x61   :  { %253 = shalt.err (!%p250_p3)
}
  0x62   :  { %141 = dma.vmem_to_hbm [thread:$0]  %s312_s12, 16, %s347_s3, [#allocation11]  }
  0x63   :  { %258 = dma.done.wait [#allocation6], 16  }
  0x64   :  { %259 = vsyncadd [#allocation6], 4294967280 }
  0x65   :  { %260 = dma.done.wait [#allocation11], 16  }
  0x66   :  { %261 = vsyncadd [#allocation11], 4294967280 }
  0x67   :  { %148 = vsyncpa [#allocation5], 1 }
  0x68   :  { %149 = vsyncpa [#allocation8], 1 }
  0x69   :  { %150 = vsyncpa [#allocation6], 1 }
  0x6a   :  { %151 = vsyncpa [#allocation11], 1 }

</bundles_post_ra>
